<compile_context>
chip_gen: v7x
topology: tpu7x:2x2x1
jax: 0.10.0
libtpu: 0.0.40
codegen_flags: <defaults>
</compile_context>

<pallas_src>
import math
import numpy as np
import jax
import jax.numpy as jnp
from jax.experimental import pallas as pl
from jax.experimental.pallas import tpu as pltpu


# ----- synthetic "config.IDA" ----------------------------------------------
SCALES = (1.0, 0.5, 0.25, 0.125)     # config.IDA.SCALES
LEVEL_OUT_DIMS = (4, 4, 4, 4)        # LEVEL{0..3}_out_dims[-1]
CLASS_NUM = 5


def bilinear_matrix(in_size, out_size):
    """1-D interpolation matrix matching torch F.interpolate(bilinear,
    align_corners=False): out = M @ in."""
    m = np.zeros((out_size, in_size), np.float32)
    scale = in_size / out_size
    for i in range(out_size):
        src = max((i + 0.5) * scale - 0.5, 0.0)
        i0 = min(int(np.floor(src)), in_size - 1)
        i1 = min(i0 + 1, in_size - 1)
        w1 = src - i0
        m[i, i0] += 1.0 - w1
        m[i, i1] += w1
    return m


def kron_interp_matrix(h_in, w_in, h_out, w_out):
    """2-D bilinear resize as a single matrix: out_flat = in_flat @ K,
    K[hi*w_in + wi, ho*w_out + wo] = Mh[ho, hi] * Mw[wo, wi]."""
    mh = bilinear_matrix(h_in, h_out)          # (h_out, h_in)
    mw = bilinear_matrix(w_in, w_out)          # (w_out, w_in)
    return np.ascontiguousarray(np.kron(mh, mw).T)   # (h_in*w_in, h_out*w_out)


def _round_up(x, m):
    return (x + m - 1) // m * m


def ida_ss_outputs_pallas(blobs, conv_w, scales, *, compute_dtype=jnp.float32):
    """Fused bilinear-upsample + channel-concat + 1x1-conv (no bias).

    blobs:  list of (N, C_b, H_b, W_b) arrays, one per scale.
    conv_w: (class_num, sum_b C_b) array (squeezed 1x1 conv weight).
    """
    nb = len(blobs)
    assert nb == len(scales)
    N = int(blobs[0].shape[0])
    c_dims = [int(b.shape[1]) for b in blobs]
    c_total = sum(c_dims)
    class_num = int(conv_w.shape[0])
    o_pad = _round_up(max(class_num, 8), 8)          # classes -> full sublanes

    blob_hw = [(int(b.shape[2]), int(b.shape[3])) for b in blobs]
    # Per-blob output size exactly as torch computes it: floor(H_b / scale).
    out_hw = [(int(math.floor(h / s)), int(math.floor(w / s)))
              for (h, w), s in zip(blob_hw, scales)]
    Hout, Wout = out_hw[0]
    if any(hw != (Hout, Wout) for hw in out_hw):
        raise ValueError(f"per-blob interpolate output sizes disagree: {out_hw}")
    HWo = Hout * Wout

    # scale == 1.0 blobs skip interpolation entirely (bilinear resize is identity).
    needs_interp = [hw != (Hout, Wout) for hw in blob_hw]
    hwin_dims = [h * w for (h, w) in blob_hw]
    n_interp = sum(needs_interp)

    # --- wrapper-side packing (lane-dense operands, few DMAs per step) ------
    # Blobs: spatial flattened so the last dim is H*W (lane axis), no (H,W) tile padding.
    xs = [jnp.asarray(b, compute_dtype).reshape(N, c_dims[i], hwin_dims[i])
          for i, b in enumerate(blobs)]

    k_all = None
    k_rows = 0
    if n_interp:
        k_np = np.concatenate(
            [kron_interp_matrix(blob_hw[b][0], blob_hw[b][1], Hout, Wout)
             for b in range(nb) if needs_interp[b]], axis=0)
        k_all = jnp.asarray(k_np, compute_dtype)     # (sum HWin_b, HWo) single constant
        k_rows = int(k_all.shape[0])

    w_pad = jnp.zeros((o_pad, c_total), jnp.float32)
    w_pad = w_pad.at[:class_num, :].set(jnp.asarray(conv_w, jnp.float32))

    def kernel(*refs):
        x_refs = refs[:nb]
        pos = nb
        k_ref = None
        if n_interp:
            k_ref = refs[pos]
            pos += 1
        w_ref = refs[pos]
        out_ref = refs[pos + 1]

        w = w_ref[...]                               # (o_pad, c_total) f32, 1 vreg
        acc = jnp.zeros((o_pad, HWo), jnp.float32)   # register accumulator, no scratch
        c_off = 0
        k_off = 0
        for b in range(nb):                          # static, unrolled over blobs
            C_b = c_dims[b]
            hwin = hwin_dims[b]
            xb = x_refs[b][0]                        # (C_b, HWin_b)
            w_b = w[:, c_off:c_off + C_b]            # (o_pad, C_b) static slice
            if not needs_interp[b]:
                # identity interp: input flows straight into the conv accumulation.
                acc = acc + jnp.dot(w_b, xb.astype(jnp.float32),
                                    preferred_element_type=jnp.float32)
            else:
                kmat = k_ref[k_off:k_off + hwin, :]  # (HWin_b, HWo) static slice load
                if C_b > o_pad:
                    # Production regime: reduce channels first, then interpolate
                    # (conv∘interp == interp∘conv); interp cost scales with o_pad.
                    t = jnp.dot(w_b, xb.astype(jnp.float32),
                                preferred_element_type=jnp.float32)      # (o_pad, HWin)
                    acc = acc + jnp.dot(t, kmat.astype(jnp.float32),
                                        preferred_element_type=jnp.float32)
                else:
                    # Toy regime (C_b <= o_pad): interpolate first, then reduce channels.
                    u = jnp.dot(xb, kmat,
                                preferred_element_type=jnp.float32)      # (C_b, HWo)
                    acc = acc + jnp.dot(w_b, u,
                                        preferred_element_type=jnp.float32)
                k_off += hwin
            c_off += C_b
        # Single lane-dense (o_pad, HWo) store.
        out_ref[0] = acc

    in_specs = []
    args = []
    for b in range(nb):
        in_specs.append(pl.BlockSpec((1, c_dims[b], hwin_dims[b]),
                                     lambda n: (n, 0, 0)))
        args.append(xs[b])
    if n_interp:
        in_specs.append(pl.BlockSpec((k_rows, HWo), lambda n: (0, 0)))
        args.append(k_all)
    in_specs.append(pl.BlockSpec((o_pad, c_total), lambda n: (0, 0)))
    args.append(w_pad)

    out_spec = pl.BlockSpec((1, o_pad, HWo), lambda n: (n, 0, 0))

    out_flat = pl.pallas_call(
        kernel,
        out_shape=jax.ShapeDtypeStruct((N, o_pad, HWo), jnp.float32),
        grid_spec=pltpu.PrefetchScalarGridSpec(
            num_scalar_prefetch=0,
            grid=(N,),                               # >= 2 steps: both v7x TCs used
            in_specs=in_specs,
            out_specs=out_spec,
            scratch_shapes=[]),                      # no VMEM scratch needed anymore
        compiler_params=pltpu.CompilerParams(
            dimension_semantics=("parallel",)),
    )(*args)

    return out_flat[:, :class_num, :].reshape(N, class_num, Hout, Wout)


def ref_forward(blobs, conv_w, scales):
    """Pure-JAX reference of the same forward pass."""
    out_hw = [(int(math.floor(int(b.shape[2]) / s)),
               int(math.floor(int(b.shape[3]) / s)))
              for b, s in zip(blobs, scales)]
    ups = []
    for x, (ho, wo) in zip(blobs, out_hw):
        wh = jnp.asarray(bilinear_matrix(int(x.shape[2]), ho))
        ww = jnp.asarray(bilinear_matrix(int(x.shape[3]), wo))
        y = jnp.einsum('oh,nchw->ncow', wh, x)
        y = jnp.einsum('pw,ncow->ncop', ww, y)
        ups.append(y)
    cat = jnp.concatenate(ups, axis=1)
    return jnp.einsum('oc,nchw->nohw', conv_w, cat)


if __name__ == "__main__":
    key = jax.random.PRNGKey(0)
    keys = jax.random.split(key, len(SCALES) + 1)

    N = 2
    Hout = Wout = 16
    blobs = []
    for idx, s in enumerate(SCALES):
        H = int(Hout * s)
        W = int(Wout * s)
        blobs.append(jax.random.normal(
            keys[idx], (N, LEVEL_OUT_DIMS[idx], H, W), jnp.float32))

    c_total = sum(LEVEL_OUT_DIMS)
    # deterministic 1x1 conv weight (o, i, 1, 1) squeezed to (o, i), no bias
    conv_w = 0.05 * jax.random.normal(keys[-1], (CLASS_NUM, c_total), jnp.float32)

    out = ida_ss_outputs_pallas(blobs, conv_w, SCALES)
    out = jax.block_until_ready(out)

    ref = ref_forward(blobs, conv_w, SCALES)
    assert out.shape == (N, CLASS_NUM, Hout, Wout)
    if not np.allclose(np.asarray(out), np.asarray(ref), atol=1e-4, rtol=1e-4):
        raise AssertionError("Pallas kernel does not match reference")
    print("KERNEL_OK")
</pallas_src>

<mosaic_0001>
module attributes {stable_mosaic.version = 11 : i64} {
  func.func @kernel(%arg0: i32, %arg1: memref<1x4x256xf32, #tpu.memory_space<vmem>>, %arg2: memref<1x4x64xf32, #tpu.memory_space<vmem>>, %arg3: memref<1x4x16xf32, #tpu.memory_space<vmem>>, %arg4: memref<1x4x4xf32, #tpu.memory_space<vmem>>, %arg5: memref<84x256xf32, #tpu.memory_space<vmem>>, %arg6: memref<8x16xf32, #tpu.memory_space<vmem>>, %arg7: memref<1x8x256xf32, #tpu.memory_space<vmem>>) attributes {dimension_semantics = [#tpu.dimension_semantics<parallel>], iteration_bounds = array<i64: 2>, scalar_prefetch = 0 : i64, scratch_operands = 0 : i64, tpu.core_type = #tpu.core_type<tc>, window_params = [{transform_indices = @transform_0, window_bounds = array<i64: 1, 4, 256>}, {transform_indices = @transform_1, window_bounds = array<i64: 1, 4, 64>}, {transform_indices = @transform_2, window_bounds = array<i64: 1, 4, 16>}, {transform_indices = @transform_3, window_bounds = array<i64: 1, 4, 4>}, {pipeline_mode = #tpu.pipeline_mode<synchronous>, transform_indices = @transform_4, window_bounds = array<i64: 84, 256>}, {pipeline_mode = #tpu.pipeline_mode<synchronous>, transform_indices = @transform_5, window_bounds = array<i64: 8, 16>}, {transform_indices = @transform_6, window_bounds = array<i64: 1, 8, 256>}]} {
    %c0 = arith.constant 0 : index
    %c0_0 = arith.constant 0 : index
    %0 = vector.load %arg6[%c0, %c0_0] : memref<8x16xf32, #tpu.memory_space<vmem>>, vector<8x16xf32>
    %cst = arith.constant 0.000000e+00 : f32
    %1 = vector.broadcast %cst : f32 to vector<8x256xf32>
    %c0_1 = arith.constant 0 : index
    %c0_2 = arith.constant 0 : index
    %c0_3 = arith.constant 0 : index
    %2 = vector.load %arg1[%c0_1, %c0_2, %c0_3] : memref<1x4x256xf32, #tpu.memory_space<vmem>>, vector<1x4x256xf32>
    %3 = vector.shape_cast %2 : vector<1x4x256xf32> to vector<4x256xf32>
    %4 = vector.extract_strided_slice %0 {offsets = [0, 0], sizes = [8, 4], strides = [1, 1]} : vector<8x16xf32> to vector<8x4xf32>
    %cst_4 = arith.constant dense<0.000000e+00> : vector<8x256xf32>
    %5 = tpu.matmul %4, %3, %cst_4 {dimension_numbers = #tpu.dot_dimension_numbers<[1], [0], [0], [1], [0, 0, 1, 1], [], []>} : vector<8x4xf32>, vector<4x256xf32>, vector<8x256xf32> -> vector<8x256xf32>
    %6 = arith.addf %1, %5 : vector<8x256xf32>
    %c0_5 = arith.constant 0 : index
    %c0_6 = arith.constant 0 : index
    %c0_7 = arith.constant 0 : index
    %7 = vector.load %arg2[%c0_5, %c0_6, %c0_7] : memref<1x4x64xf32, #tpu.memory_space<vmem>>, vector<1x4x64xf32>
    %8 = vector.shape_cast %7 : vector<1x4x64xf32> to vector<4x64xf32>
    %9 = vector.extract_strided_slice %0 {offsets = [0, 4], sizes = [8, 4], strides = [1, 1]} : vector<8x16xf32> to vector<8x4xf32>
    %c0_8 = arith.constant 0 : index
    %c0_9 = arith.constant 0 : index
    %10 = vector.load %arg5[%c0_8, %c0_9] : memref<84x256xf32, #tpu.memory_space<vmem>>, vector<64x256xf32>
    %cst_10 = arith.constant dense<0.000000e+00> : vector<4x256xf32>
    %11 = tpu.matmul %8, %10, %cst_10 {dimension_numbers = #tpu.dot_dimension_numbers<[1], [0], [0], [1], [0, 0, 1, 1], [], []>} : vector<4x64xf32>, vector<64x256xf32>, vector<4x256xf32> -> vector<4x256xf32>
    %cst_11 = arith.constant dense<0.000000e+00> : vector<8x256xf32>
    %12 = tpu.matmul %9, %11, %cst_11 {dimension_numbers = #tpu.dot_dimension_numbers<[1], [0], [0], [1], [0, 0, 1, 1], [], []>} : vector<8x4xf32>, vector<4x256xf32>, vector<8x256xf32> -> vector<8x256xf32>
    %13 = arith.addf %6, %12 : vector<8x256xf32>
    %c0_12 = arith.constant 0 : index
    %c0_13 = arith.constant 0 : index
    %c0_14 = arith.constant 0 : index
    %14 = vector.load %arg3[%c0_12, %c0_13, %c0_14] : memref<1x4x16xf32, #tpu.memory_space<vmem>>, vector<1x4x16xf32>
    %15 = vector.shape_cast %14 : vector<1x4x16xf32> to vector<4x16xf32>
    %16 = vector.extract_strided_slice %0 {offsets = [0, 8], sizes = [8, 4], strides = [1, 1]} : vector<8x16xf32> to vector<8x4xf32>
    %c64 = arith.constant 64 : index
    %c0_15 = arith.constant 0 : index
    %17 = vector.load %arg5[%c64, %c0_15] : memref<84x256xf32, #tpu.memory_space<vmem>>, vector<16x256xf32>
    %cst_16 = arith.constant dense<0.000000e+00> : vector<4x256xf32>
    %18 = tpu.matmul %15, %17, %cst_16 {dimension_numbers = #tpu.dot_dimension_numbers<[1], [0], [0], [1], [0, 0, 1, 1], [], []>} : vector<4x16xf32>, vector<16x256xf32>, vector<4x256xf32> -> vector<4x256xf32>
    %cst_17 = arith.constant dense<0.000000e+00> : vector<8x256xf32>
    %19 = tpu.matmul %16, %18, %cst_17 {dimension_numbers = #tpu.dot_dimension_numbers<[1], [0], [0], [1], [0, 0, 1, 1], [], []>} : vector<8x4xf32>, vector<4x256xf32>, vector<8x256xf32> -> vector<8x256xf32>
    %20 = arith.addf %13, %19 : vector<8x256xf32>
    %c0_18 = arith.constant 0 : index
    %c0_19 = arith.constant 0 : index
    %c0_20 = arith.constant 0 : index
    %21 = vector.load %arg4[%c0_18, %c0_19, %c0_20] : memref<1x4x4xf32, #tpu.memory_space<vmem>>, vector<1x4x4xf32>
    %22 = vector.shape_cast %21 : vector<1x4x4xf32> to vector<4x4xf32>
    %23 = vector.extract_strided_slice %0 {offsets = [0, 12], sizes = [8, 4], strides = [1, 1]} : vector<8x16xf32> to vector<8x4xf32>
    %c80 = arith.constant 80 : index
    %c0_21 = arith.constant 0 : index
    %24 = vector.load %arg5[%c80, %c0_21] : memref<84x256xf32, #tpu.memory_space<vmem>>, vector<4x256xf32>
    %cst_22 = arith.constant dense<0.000000e+00> : vector<4x256xf32>
    %25 = tpu.matmul %22, %24, %cst_22 {dimension_numbers = #tpu.dot_dimension_numbers<[1], [0], [0], [1], [0, 0, 1, 1], [], []>} : vector<4x4xf32>, vector<4x256xf32>, vector<4x256xf32> -> vector<4x256xf32>
    %cst_23 = arith.constant dense<0.000000e+00> : vector<8x256xf32>
    %26 = tpu.matmul %23, %25, %cst_23 {dimension_numbers = #tpu.dot_dimension_numbers<[1], [0], [0], [1], [0, 0, 1, 1], [], []>} : vector<8x4xf32>, vector<4x256xf32>, vector<8x256xf32> -> vector<8x256xf32>
    %27 = arith.addf %20, %26 : vector<8x256xf32>
    %c0_24 = arith.constant 0 : index
    %c0_25 = arith.constant 0 : index
    %c0_26 = arith.constant 0 : index
    %28 = vector.load %arg7[%c0_24, %c0_25, %c0_26] : memref<1x8x256xf32, #tpu.memory_space<vmem>>, vector<1x8x256xf32>
    %29 = vector.shape_cast %28 : vector<1x8x256xf32> to vector<8x256xf32>
    %30 = vector.shape_cast %27 : vector<8x256xf32> to vector<1x8x256xf32>
    tpu.vector_store %arg7[%c0_24, %c0_25, %c0_26], %30 {strides = array<i32>} : memref<1x8x256xf32, #tpu.memory_space<vmem>>, vector<1x8x256xf32>,
    return
  }
  func.func @transform_0(%arg0: i32) -> (i32, i32, i32) {
    %c0_i32 = arith.constant 0 : i32
    %c0_i32_0 = arith.constant 0 : i32
    %c0_i32_1 = arith.constant 0 : i32
    return %arg0, %c0_i32, %c0_i32_0 : i32, i32, i32
  }
  func.func @transform_1(%arg0: i32) -> (i32, i32, i32) {
    %c0_i32 = arith.constant 0 : i32
    %c0_i32_0 = arith.constant 0 : i32
    %c0_i32_1 = arith.constant 0 : i32
    return %arg0, %c0_i32, %c0_i32_0 : i32, i32, i32
  }
  func.func @transform_2(%arg0: i32) -> (i32, i32, i32) {
    %c0_i32 = arith.constant 0 : i32
    %c0_i32_0 = arith.constant 0 : i32
    %c0_i32_1 = arith.constant 0 : i32
    return %arg0, %c0_i32, %c0_i32_0 : i32, i32, i32
  }
  func.func @transform_3(%arg0: i32) -> (i32, i32, i32) {
    %c0_i32 = arith.constant 0 : i32
    %c0_i32_0 = arith.constant 0 : i32
    %c0_i32_1 = arith.constant 0 : i32
    return %arg0, %c0_i32, %c0_i32_0 : i32, i32, i32
  }
  func.func @transform_4(%arg0: i32) -> (i32, i32) {
    %c0_i32 = arith.constant 0 : i32
    %c0_i32_0 = arith.constant 0 : i32
    %c0_i32_1 = arith.constant 0 : i32
    return %c0_i32, %c0_i32_0 : i32, i32
  }
  func.func @transform_5(%arg0: i32) -> (i32, i32) {
    %c0_i32 = arith.constant 0 : i32
    %c0_i32_0 = arith.constant 0 : i32
    %c0_i32_1 = arith.constant 0 : i32
    return %c0_i32, %c0_i32_0 : i32, i32
  }
  func.func @transform_6(%arg0: i32) -> (i32, i32, i32) {
    %c0_i32 = arith.constant 0 : i32
    %c0_i32_0 = arith.constant 0 : i32
    %c0_i32_1 = arith.constant 0 : i32
    return %arg0, %c0_i32, %c0_i32_0 : i32, i32, i32
  }
}

</mosaic_0001>

<bundles_post_ra>
// kernel: tpu_custom_call.1
= control target key start
LH: loop header
LB: loop body
LE: loop exit
PB: predicated region body
PF: predicated region fallthrough
CT: control target
= control target key end

     0   :  { %s1801_s0 = inlined_call_operand.hbm [shape: f32[2,4,256], index: 0, kind: input, shape index: {}]   ;;  %s1802_s1 = inlined_call_operand.hbm [shape: f32[2,4,64], index: 1, kind: input, shape index: {}]   ;;  %s1803_s2 = inlined_call_operand.hbm [shape: f32[2,4,16], index: 2, kind: input, shape index: {}]   ;;  %s1804_s3 = inlined_call_operand.vmem [shape: f32[2,4,4], index: 3, kind: input, shape index: {}]   ;;  %s1805_s4 = inlined_call_operand.hbm [shape: f32[84,256], index: 4, kind: input, shape index: {}]   ;;  %s1806_s5 = inlined_call_operand.vmem [shape: f32[8,16], index: 5, kind: input, shape index: {}]   ;;  %s1807_s6 = inlined_call_operand.hbm [shape: f32[2,8,256], index: 6, kind: output, shape index: {}]  }
   0x1   :  { %1824 = sst [smem:[#allocation21_spill]] %s1802_s1 }
   0x2   :  { %11 = vsyncpa [#allocation3], 0 }
   0x3   :  { %13 = vsyncpa [#allocation3 + $0x1], 0 }
   0x4   :  { %14 = vsyncpa [#allocation6], 0 }
   0x5   :  { %16 = vsyncpa [#allocation6 + $0x1], 0 }
   0x6   :  { %17 = vsyncpa [#allocation9], 0 }
   0x7   :  { %18 = vsyncpa [#allocation4], 0 }
   0x8   :  { %20 = vsyncpa [#allocation4 + $0x1], 0  ;;  %s1491_s21 = smov 0   ;;  %s1493_s22 = smov 0  }
   0x9   :  { %s1495_s23 = smov 0   ;;  %s1497_s24 = smov 0  }
   0xa LB: > { %1825 = sst [smem:[#allocation15_spill]] %s1431_s21  ;;  %s1512_s25 = sadd.s32 1, %s1443_s24   ;;  %s1443_s24 = sphi %s1497_s24, %s1854_s24   ;;  %s1439_s23 = sphi %s1495_s23, %s1856_s23   ;;  %s1435_s22 = sphi %s1493_s22, %s1858_s22   ;;  %s1431_s21 = sphi %s1491_s21, %s1857_s21  }
   0xb   : > { %1826 = sst [smem:[#allocation16_spill]] %s1439_s23  ;;  %s33_s26 = sadd.s32 1, %s1439_s23 }
   0xc   : > { %1827 = sst [smem:[#allocation17_spill]] %s1443_s24  ;;  %s30_s27 = ssub.s32 %s1443_s24, %s1512_s25 }
   0xd   : > { %1828 = sst [smem:[#allocation18_spill]] %s1512_s25  ;;  %p1808_p0 = scmp.ne.s32.totalorder %s1439_s23, %s1435_s22 }
   0xe   : > { %p31_p1 = scmp.eq.s32.totalorder %s30_s27, 0  ;;  %p41_p2 = scmp.eq.s32.totalorder %s1443_s24, 0 }
   0xf   : > { %p1208_p4 = scmp.lt.s32.totalorder %s1443_s24, 2  ;;  %s1529_s29 = sand.u32 1, %s1439_s23  }
  0x10   : > { %s1523_s28 = scalar_select %p31_p1, %s1439_s23, %s33_s26  }
  0x11   : > { %p42_p5 = por %p41_p2, %p1808_p0  ;;  %s251_s30 = sand.u32 1, %s1443_s24  }
  0x12   : > { %1829 = sst [smem:[#allocation19_spill]] %s1523_s28  ;;  %s1809_s7 = sshll.u32 %s1529_s29, 2 }
  0x13   : > { %p1533_p6 = pnand %p1208_p4, %p42_p5  ;;  %s1117_s9 = sshll.u32 %s1443_s24, 6 }
  0x14   : > { %s1831_s1 = sld [smem:[#allocation21_spill]]  ;;  %s255_s13 = scalar_lea.vmem [#allocation5], %s1809_s7 }
  0x15   : > { %s1830_s8 = scalar_select %p1533_p6, 1, 0 }
  0x16   : > { %s262_s14 = sshll.u32 %s255_s13, 4  ;;  %s1550_s17 = scalar_lea.hbm %s1803_s2, %s1117_s9  ;;  %s1545_s14 = int_to_ptr.vmem [resolvable:$true] %s262_s14 }
  0x17   : > { %s1552_s18 = scalar_lea.sflag [#allocation6], %s251_s30  ;;  %p1558_p8 = pneg %p1533_p6 }
  0x19   : > { %s1832_s20 = scalar_select %p1558_p8, 1, 0 }
  0x1a   : > { %s1541_s12 = scalar_lea.hbm %s1831_s1, %s1117_s9  ;;  %s1256_s10 = scalar_lea.hbm %s1831_s1, 128 }
  0x1b   : > { %s1251_s19 = scalar_lea.hbm %s1541_s12, 64  ;;  %p1257_p11 = scmp.lt.u32.totalorder %s1541_s12, %s1831_s1 }
  0x1c   : > { %p1252_p7 = scmp.ne.s32.totalorder %s1541_s12, %s1251_s19  ;;  %p1258_p12 = scmp.lt.u32.totalorder %s1256_s10, %s1251_s19 }
  0x1d   : > { %p1260_p1 = scmp.lt.u32.totalorder %s1251_s19, %s1541_s12 }
  0x1e   : > { %p1254_p9 = pnand %p1558_p8, %p1252_p7  ;;  %p1259_p13 = por %p1258_p12, %p1257_p11 }
  0x20   : > { %p1255_p10 = pneg %p1254_p9  ;;  %p1261_p2 = por %p1260_p1, %p1259_p13 }
  0x22   : > { %p1262_p4 = pnand %p1261_p2, %p1255_p10 }
  0x24   : > { %1265 = shalt.err (!%p1262_p4)
}
  0x25   : > { %s1266_s30 = scalar_lea.vmem %s1545_s14, 64  ;;  %s1445_s13 = smov [#allocation5]  }
  0x26   : > { %p1267_p5 = scmp.ne.s32.totalorder %s1545_s14, %s1266_s30  ;;  %s1271_s15 = sshll.u32 %s1445_s13, 4  ;;  %s1272_s15 = int_to_ptr.vmem [resolvable:$false] %s1271_s15 }
  0x27   : > { %s1273_s16 = scalar_lea.vmem %s1272_s15, 128  ;;  %p1274_p3 = scmp.lt.s32.totalorder %s1545_s14, %s1272_s15 }
  0x28   : > { %p1269_p7 = pnand %p1267_p5, %p1558_p8  ;;  %p1275_p0 = scmp.lt.s32.totalorder %s1273_s16, %s1266_s30 }
  0x2a   : > { %p1270_p9 = pneg %p1269_p7  ;;  %p1276_p11 = por %p1275_p0, %p1274_p3 }
  0x2c   : > { %p1277_p12 = pnand %p1276_p11, %p1270_p9 }
  0x2e   : > { %1280 = shalt.err (!%p1277_p12)
}
  0x2f   : > { %1199 = dma.hbm_to_vmem [thread:$0]  (!%p1533_p6), %s1541_s12, 64, %s1545_s14, %s1552_s18  }
  0x30   : > { %s1583_s19 = sadd.s32 4294967295, %s1443_s24   ;;  %s1109_s26 = sadd.s32 4294967294, %s1443_s24  }
  0x31   : > { %p46_p0 = scmp.ne.s32.totalorder %s1435_s22, %s1431_s21  ;;  %p1815_p3 = scmp.eq.s32.totalorder %s1583_s19, 0 }
  0x32   : > { %p190_p10 = scmp.eq.s32.totalorder %s1583_s19, 1  ;;  %p196_p13 = scmp.eq.s32.totalorder %s1109_s26, 1 }
  0x33   : > { %p1592_p1 = por %p1815_p3, %p46_p0  ;;  %p1110_p2 = scmp.ge.s32.totalorder %s1443_s24, 1 }
  0x34   : > { %p1834_p4 = scmp.ne.s32.totalorder %s1439_s23, %s1435_s22  ;;  %p1604_p7 = por %p196_p13, %p46_p0 }
  0x35   : > { %s1833_s27 = scalar_select %p1592_p1, 1, 0 }
  0x36   : > { %p1600_p5 = por %p190_p10, %p1834_p4  ;;  %p203_p9 = scmp.lt.s32.totalorder %s1443_s24, 3 }
  0x37   : > { %s1836_s14 = scalar_select %p1604_p7, 1, 0 }
  0x38   : > { %s1835_s12 = scalar_select %p1600_p5, 1, 0 }
  0x39   : > { %1837 = sst [smem:[#allocation20_spill]] %s1836_s14  ;;  %p1609_p11 = pnand %p1110_p2, %p203_p9 }
  0x3a   : > { %s1446_s11 = smov [#allocation8]   ;;  %s1113_s30 = sshll.u32 %s1529_s29, 3 }
  0x3b   : > { %s1838_s10 = scalar_select %p1609_p11, 1, 0 }
  0x3c   : > { %s215_s9 = sshll.u32 %s1446_s11, 4  ;;  %p1189_p12 = pneg %p1609_p11  ;;  %s1613_s9 = int_to_ptr.vmem [resolvable:$true] %s215_s9 }
  0x3d   : > { %s1149_s13 = sshll.u32 %s1443_s24, 7  ;;  %s236_s1 = scalar_lea.vmem [#allocation2], %s1113_s30 }
  0x3e   : > { %p1621_p10 = pnand %p1189_p12, %p1815_p3  ;;  %s1628_s7 = scalar_lea.hbm %s1801_s0, %s1149_s13 }
  0x3f   : > { %s244_s28 = sshll.u32 %s236_s1, 4  ;;  %s1281_s25 = scalar_lea.hbm %s1805_s4, 2816  ;;  %s1630_s28 = int_to_ptr.vmem [resolvable:$true] %s244_s28 }
  0x40   : > { %p1282_p0 = scmp.ne.s32.totalorder %s1805_s4, %s1281_s25  ;;  %p1283_p13 = pneg %p1621_p10 }
  0x41   : > { %p1288_p9 = scmp.lt.u32.totalorder %s1281_s25, %s1805_s4 }
  0x42   : > { %p1284_p2 = pnand %p1283_p13, %p1282_p0 }
  0x44   : > { %p1285_p4 = pneg %p1284_p2 }
  0x46   : > { %p1290_p12 = pnand %p1288_p9, %p1285_p4 }
  0x48   : > { %1293 = shalt.err (!%p1290_p12)
}
  0x49   : > { %s1294_s1 = scalar_lea.vmem %s1613_s9, 2816  ;;  %p1302_p1 = scmp.lt.s32.totalorder %s1613_s9, %s1613_s9 }
  0x4a   : > { %p1295_p3 = scmp.ne.s32.totalorder %s1613_s9, %s1294_s1  ;;  %p1303_p11 = scmp.lt.s32.totalorder %s1294_s1, %s1294_s1 }
  0x4c   : > { %p1297_p7 = pnand %p1295_p3, %p1283_p13  ;;  %p1304_p6 = por %p1303_p11, %p1302_p1 }
  0x4e   : > { %p1298_p5 = pneg %p1297_p7 }
  0x50   : > { %p1305_p8 = pnand %p1304_p6, %p1298_p5 }
  0x52   : > { %1308 = shalt.err (!%p1305_p8)
}
  0x53   : > { %s1447_s23 = smov 256   ;;  %s1448_s24 = smov 16  }
  0x54   : > { %1192 = dma.hbm_to_vmem [thread:$0]  (!%p1621_p10), %s1805_s4, 2816, %s1613_s9, [#allocation9], %s1447_s23, %s1447_s23, %s1448_s24  }
  0x55   : > { %s233_s30 = scalar_lea.sflag [#allocation3], %s1529_s29  ;;  %s1309_s13 = scalar_lea.hbm %s1628_s7, 128 }
  0x56   : > { %p1310_p3 = scmp.ne.s32.totalorder %s1628_s7, %s1309_s13  ;;  %p1840_p6 = scmp.ne.s32.totalorder %s1832_s20, 0 }
  0x57   : > { %s1314_s26 = scalar_lea.hbm %s1801_s0, 256  ;;  %p1315_p5 = scmp.lt.u32.totalorder %s1628_s7, %s1801_s0 }
  0x58   : > { %p1312_p8 = pnand %p1310_p3, %p1840_p6  ;;  %p1316_p7 = scmp.lt.u32.totalorder %s1314_s26, %s1309_s13 }
  0x59   : > { %p1318_p0 = scmp.lt.u32.totalorder %s1309_s13, %s1628_s7 }
  0x5a   : > { %p1313_p1 = pneg %p1312_p8  ;;  %p1317_p11 = por %p1316_p7, %p1315_p5 }
  0x5c   : > { %p1319_p13 = por %p1318_p0, %p1317_p11 }
  0x5e   : > { %p1320_p2 = pnand %p1319_p13, %p1313_p1 }
  0x60   : > { %1323 = shalt.err (!%p1320_p2)
}
  0x61   : > { %s1324_s9 = scalar_lea.vmem %s1630_s28, 128  ;;  %s1449_s15 = smov [#allocation2]  }
  0x62   : > { %p1325_p10 = scmp.ne.s32.totalorder %s1630_s28, %s1324_s9  ;;  %s1329_s23 = sshll.u32 %s1449_s15, 4  ;;  %s1330_s23 = int_to_ptr.vmem [resolvable:$false] %s1329_s23 }
  0x63   : > { %s1331_s21 = scalar_lea.vmem %s1330_s23, 256  ;;  %p1332_p12 = scmp.lt.s32.totalorder %s1630_s28, %s1330_s23 }
  0x64   : > { %p1327_p4 = pnand %p1325_p10, %p1840_p6  ;;  %p1333_p3 = scmp.lt.s32.totalorder %s1331_s21, %s1324_s9 }
  0x66   : > { %p1328_p9 = pneg %p1327_p4  ;;  %p1334_p8 = por %p1333_p3, %p1332_p12 }
  0x68   : > { %p1335_p5 = pnand %p1334_p8, %p1328_p9 }
  0x6a   : > { %1338 = shalt.err (!%p1335_p5)
}
  0x6b   : > { %p1841_p1 = scmp.ne.s32.totalorder %s1830_s8, 0  ;;  %s1842_s24 = sshll.u32 %s1529_s29, 2 }
  0x6c   : > { %s273_s25 = scalar_lea.vmem [#allocation7], %s1842_s24  ;;  %s1339_s13 = scalar_lea.hbm %s1550_s17, 64 }
  0x6d   : > { %1196 = dma.hbm_to_vmem [thread:$0]  (!%p1841_p1), %s1628_s7, 128, %s1630_s28, %s233_s30  }
  0x6e   : > { %s280_s14 = sshll.u32 %s273_s25, 4  ;;  %p1340_p7 = scmp.ne.s32.totalorder %s1550_s17, %s1339_s13  ;;  %s281_s14 = int_to_ptr.vmem [resolvable:$true] %s280_s14 }
  0x6f   : > { %s1344_s26 = scalar_lea.hbm %s1803_s2, 128  ;;  %p1345_p13 = scmp.lt.u32.totalorder %s1550_s17, %s1803_s2 }
  0x70   : > { %p1342_p11 = pnand %p1340_p7, %p1840_p6  ;;  %p1346_p2 = scmp.lt.u32.totalorder %s1344_s26, %s1339_s13 }
  0x71   : > { %p1348_p4 = scmp.lt.u32.totalorder %s1339_s13, %s1550_s17 }
  0x72   : > { %p1343_p0 = pneg %p1342_p11  ;;  %p1347_p10 = por %p1346_p2, %p1345_p13 }
  0x74   : > { %p1349_p9 = por %p1348_p4, %p1347_p10 }
  0x76   : > { %p1350_p12 = pnand %p1349_p9, %p1343_p0 }
  0x78   : > { %1353 = shalt.err (!%p1350_p12)
}
  0x79   : > { %s1354_s28 = scalar_lea.vmem %s281_s14, 64  ;;  %s1450_s29 = smov [#allocation7]  }
  0x7a   : > { %p1355_p3 = scmp.ne.s32.totalorder %s281_s14, %s1354_s28  ;;  %s1359_s7 = sshll.u32 %s1450_s29, 4  ;;  %s1360_s7 = int_to_ptr.vmem [resolvable:$false] %s1359_s7 }
  0x7b   : > { %s1361_s30 = scalar_lea.vmem %s1360_s7, 128  ;;  %p1362_p7 = scmp.lt.s32.totalorder %s281_s14, %s1360_s7 }
  0x7c   : > { %p1357_p8 = pnand %p1355_p3, %p1840_p6  ;;  %p1363_p11 = scmp.lt.s32.totalorder %s1361_s30, %s1354_s28 }
  0x7e   : > { %p1358_p5 = pneg %p1357_p8  ;;  %p1364_p1 = por %p1363_p11, %p1362_p7 }
  0x80   : > { %p1365_p2 = pnand %p1364_p1, %p1358_p5 }
  0x82   : > { %1368 = shalt.err (!%p1365_p2)
}
  0x83   : > { %p1843_p13 = scmp.ne.s32.totalorder %s1830_s8, 0  ;;  %p1844_p0 = scmp.ne.s32.totalorder %s1838_s10, 0 }
  0x84   : > { %s1698_s20 = sand.u32 (!%p1844_p0), 1, %s1435_s22   ;;  %p1845_p6 = scmp.ne.s32.totalorder (!%p1844_p0), %s1833_s27, 0 }
  0x85   : > { %1202 = dma.hbm_to_vmem [thread:$0]  (!%p1843_p13), %s1550_s17, 64, %s281_s14, %s1552_s18  }
  0x86   : > { %296 = sbr.rel (%p1844_p0) target bundleno = 820 (0x334), region = 44  ;;  %s1121_s15 = sshll.u32 (!%p1844_p0), %s1698_s20, 3 }
  0x87   : > { %s299_s23 = scalar_lea.sflag (!%p1844_p0), [#allocation3], %s1698_s20  ;;  %s302_s21 = scalar_lea.vmem (!%p1844_p0), [#allocation2], %s1121_s15 }
  0x8d   : > { %1414 = dma.done.wait (%p1845_p6), %s299_s23, 128  }
  0x8e   : > { %1416 = vsyncadd (%p1845_p6), %s299_s23, 4294967168  ;;  %s307_s8 = sand.u32 1, %s1583_s19   ;;  %s1122_s17 = sshll.u32 %s1698_s20, 2 }
  0x8f   : > { %s308_s18 = scalar_lea.sflag [#allocation6], %s307_s8  ;;  %s1708_s10 = scalar_lea.vmem [#allocation5], %s1122_s17 }
  0x90   : > { %1418 = dma.done.wait (%p1845_p6), %s308_s18, 128  }
  0x91   : > { %1420 = vsyncadd (%p1845_p6), %s308_s18, 4294967168  ;;  %s1714_s24 = scalar_lea.vmem [#allocation7], %s1122_s17  ;;  %p1846_p1 = scmp.eq.s32.totalorder %s1583_s19, 0 }
  0x93   : > { %1422 = dma.done.wait (%p1846_p1), [#allocation9], 2816   ;;  %p1847_p10 = pmov %p1846_p1 }
  0x94   : > { %v1451_v0 = vmov 0.0   ;;  %v372_v1 = vld [vmem:[%s302_s21] sm:$0xff]  ;;  %vm471_vm0 = vcmask 1043456   ;;  %v632_v5 = vld [vmem:[#allocation8 + $0x98] sm:$0xff]  ;;  %v631_v7 = vld [vmem:[#allocation8 + $0x90] sm:$0xff]  ;;  %s1452_s27 = smov 120  }
  0x95   : > { %1424 = vsyncadd (%p1847_p10), [#allocation9], 4294964480  ;;  %621 = vmatprep.mubr.f32.mxu1 %v1451_v0  ;;  %458 = vmatprep.mubr.f32.mxu0 %v1451_v0  ;;  %v371_v2 = vld [vmem:[%s1806_s5] sm:$0xff]  ;;  %v630_v3 = vld [vmem:[#allocation8 + $0x88] sm:$0xff]  ;;  %v550_v4 = vcombine.high %v372_v1, %v372_v1  ;;  %vm468_vm1 = vcmask 31744   ;;  %vm633_vm2 = vcmask 130048  }
  0x96   : > { %v629_v6 = vld [vmem:[#allocation8 + $0x80] sm:$0xff]  ;;  %708 = vrot.lane.b32.xlu0 %v371_v2, %s1452_s27  ;;  %v1167_v8 = vpack.c.bf16 %v632_v5, %v630_v3  ;;  %v375_v10 = vld [vmem:[#allocation8 + $0x8] sm:$0xff]  ;;  %v377_v11 = vld [vmem:[#allocation8 + $0x18] sm:$0xff]  ;;  %vm390_vm3 = vcmask 523264   ;;  %s1453_s13 = smov 116   ;;  %s1454_s11 = smov 124  }
  0x97   : > { %v1169_v9 = vpack.c.bf16 %v631_v7, %v629_v6  ;;  %1131 = vmatprep.subr.msk.mxu1 %vm471_vm0, %v550_v4  ;;  %v1151_v12 = vpack.c.bf16 %v377_v11, %v375_v10  ;;  %v374_v13 = vld [vmem:[#allocation8] sm:$0xff]  ;;  %v376_v14 = vld [vmem:[#allocation8 + $0x10] sm:$0xff]  ;;  %v379_v15 = vld [vmem:[#allocation8 + $0x28] sm:$0xff]  ;;  %874 = vrot.lane.b32.xlu1 %v371_v2, %s1453_s13  ;;  %p367_p4 = scmp.lt.s32.totalorder %s1583_s19, 1  ;;  %s1125_s29 = sshll.u32 %s1698_s20, 4 }
  0x98   : > { %1132 = vmatpush1.msk.msra.mxu1 %vm471_vm0, %v372_v1  ;;  %v1153_v16 = vpack.c.bf16 %v376_v14, %v374_v13  ;;  %v381_v17 = vld [vmem:[#allocation8 + $0x38] sm:$0xff]  ;;  %v378_v19 = vld [vmem:[#allocation8 + $0x20] sm:$0xff]  ;;  %v380_v20 = vld [vmem:[#allocation8 + $0x30] sm:$0xff]  ;;  %s1150_s7 = sshll.u32 %s1583_s19, 8  ;;  %s366_s30 = scalar_lea.vmem [#allocation10], %s1125_s29 }
  0x99   : > { %1133 = vmatmul.mubr.msk.f32.vlgmr.msra.gmra.mrb[0].mxu1 %vm468_vm1, %v371_v2  ;;  %1168 = vmatprep.subr.bf16.mxu1 %v1167_v8  ;;  %v1155_v18 = vpack.c.bf16 %v381_v17, %v379_v15  ;;  %v628_v21 = vld [vmem:[%s1714_s24] sm:$0xf]  ;;  %v383_v22 = vld [vmem:[#allocation8 + $0x48] sm:$0xff]  ;;  %v1157_v24 = vpack.c.bf16 %v380_v20, %v378_v19  ;;  %v382_v26 = vld [vmem:[#allocation8 + $0x40] sm:$0xff]  ;;  %s368_s16 = scalar_select %p367_p4, %s1583_s19, 1 }
  0x9a   : > { %1170 = vmatpush1.bf16.msra.mxu1 %v1169_v9  ;;  %701 = vmatprep.mubr.f32.mxu1 %v1451_v0  ;;  %v385_v23 = vld [vmem:[#allocation8 + $0x58] sm:$0xff]  ;;  %v384_v27 = vld [vmem:[#allocation8 + $0x50] sm:$0xff]  ;;  %v387_v29 = vld [vmem:[#allocation8 + $0x68] sm:$0xff]  ;;  %s974_s15 = sshll.u32 %s366_s30, 4  ;;  %s1757_s8 = scalar_lea.hbm %s1807_s6, %s1150_s7  ;;  %s1759_s15 = int_to_ptr.vmem [resolvable:$true] %s974_s15 }
  0x9b   : > { %1152 = vmatprep.subr.bf16.mxu0 %v1151_v12  ;;  %v1159_v25 = vpack.c.bf16 %v385_v23, %v383_v22  ;;  %v1161_v28 = vpack.c.bf16 %v384_v27, %v382_v26  ;;  %v389_v30 = vld [vmem:[#allocation8 + $0x78] sm:$0xff]  ;;  %v386_v32 = vld [vmem:[#allocation8 + $0x60] sm:$0xff]  ;;  %v388_v33 = vld [vmem:[#allocation8 + $0x70] sm:$0xff]  ;;  %466 = vrot.lane.b32.xlu0 %v371_v2, %s1454_s11  ;;  %s1126_s26 = sshll.u32 %s368_s16, 2  ;;  %s960_s17 = scalar_lea.sflag [#allocation4], %s1698_s20 }
  0x9c   : > { %1154 = vmatpush1.bf16.msra.mxu0 %v1153_v16  ;;  %v1163_v31 = vpack.c.bf16 %v389_v30, %v387_v29  ;;  %v1165_v34 = vpack.c.bf16 %v388_v33, %v386_v32  ;;  %v373_v35 = vld [vmem:[%s1708_s10] sm:$0xf]  ;;  %v793_v39 = vld [vmem:[#allocation8 + $0xa8] sm:$0xf]  ;;  %v792_v40 = vld [vmem:[#allocation8 + $0xa0] sm:$0xf]  ;;  %s370_s28 = scalar_lea.vmem %s1804_s3, %s1126_s26 }
  0x9d   : > { %1134 = vmatmul.mubr.msk.f32.vlgmr.msra.gmra.mrb[2].mxu1 %vm633_vm2, %v628_v21  ;;  %1156 = vmatprep.subr.bf16.mxu0 %v1155_v18  ;;  %v791_v41 = vld [vmem:[%s370_s28] sm:$0xf]  ;;  %s1369_s19 = scalar_lea.vmem %s1759_s15, 256  ;;  %p1848_p12 = scmp.ne.s32.totalorder %s1835_s12, 0 }
  0x9e   : > { %782 = vmatprep.mubr.f32.mxu1 %v1451_v0  ;;  %p1370_p9 = scmp.ne.s32.totalorder %s1759_s15, %s1369_s19  ;;  %s1455_s18 = smov [#allocation10]  }
  0x9f   : > { %s1373_s10 = sshll.u32 %s1455_s18, 4  ;;  %s1374_s10 = int_to_ptr.vmem [resolvable:$false] %s1373_s10 }
  0xa0   : > { %1158 = vmatpush1.bf16.msra.mxu0 %v1157_v24  ;;  %p1371_p3 = pnand %p1370_p9, %p1848_p12  ;;  %s1375_s24 = scalar_lea.vmem %s1374_s10, 512 }
  0xa1   : > { %1160 = vmatprep.subr.bf16.mxu0 %v1159_v25  ;;  %p1376_p5 = scmp.lt.s32.totalorder %s1759_s15, %s1374_s10  ;;  %p1377_p7 = scmp.lt.s32.totalorder %s1375_s24, %s1369_s19 }
  0xa2   : > { %p1372_p8 = pneg %p1371_p3 }
  0xa3   : > { %p1378_p11 = por %p1377_p7, %p1376_p5 }
  0xa4   : > { %1162 = vmatpush1.bf16.msra.mxu0 %v1161_v28 }
  0xa5   : > { %1164 = vmatprep.subr.bf16.mxu0 %v1163_v31  ;;  %p1379_p2 = pnand %p1378_p11, %p1372_p8 }
  0xa8   : > { %1166 = vmatpush1.bf16.msra.mxu0 %v1165_v34 }
  0xab   : > { %1127 = vmatmul.mubr.msk.f32.vlgmr.msra.gmra.mrb[0].mxu0 %vm390_vm3, %v373_v35 }
  0xac   : > { %542 = vmatprep.mubr.f32.mxu0 %v1451_v0 }
 0x108   : > { %v709_v38 = vpop.permute.xlu0 %708 }
 0x109   : > { %v875_v47 = vpop.permute.xlu1 %874 }
 0x10d   : > { %v467_v44 = vpop.permute.xlu0 %466 }
 0x170   : > { %v703_v36 = vpop.f32.mrb[2].mxu1 }
 0x171   : > { %v705_v37 = vpop.f32.mrb[3].mxu1 }
 0x172   : > { %1135 = vmatprep.subr.msk.mxu1 %vm471_vm0, %v705_v37 }
 0x173   : > { %1136 = vmatpush1.msk.msra.mxu1 %vm471_vm0, %v703_v36 }
 0x174   : > { %1137 = vmatmul.mubr.msk.f32.vlgmr.msra.gmra.mrb[0].mxu1 %vm468_vm1, %v709_v38  ;;  %1138 = vmatprep.subr.msk.mxu1 %vm471_vm0, %v793_v39 }
 0x175   : > { %1139 = vmatpush1.msk.msra.mxu1 %vm471_vm0, %v792_v40  ;;  %867 = vmatprep.mubr.f32.mxu1 %v1451_v0 }
 0x178   : > { %1140 = vmatmul.mubr.msk.f32.vlgmr.msra.gmra.mrb[4].mxu1 %vm468_vm1, %v791_v41 }
 0x179   : > { %948 = vmatprep.mubr.f32.mxu1 %v1451_v0 }
 0x17e   : > { %v460_v42 = vpop.f32.mrb[0].mxu0 }
 0x17f   : > { %v462_v43 = vpop.f32.mrb[1].mxu0 }
 0x180   : > { %1128 = vmatprep.subr.msk.mxu0 %vm471_vm0, %v462_v43 }
 0x181   : > { %1129 = vmatpush1.msk.msra.mxu0 %vm471_vm0, %v460_v42 }
 0x182   : > { %1130 = vmatmul.mubr.msk.f32.vlgmr.msra.gmra.mrb[2].mxu0 %vm468_vm1, %v467_v44 }
 0x24b   : > { %v869_v45 = vpop.f32.mrb[4].mxu1 }
 0x24c   : > { %v871_v46 = vpop.f32.mrb[5].mxu1 }
 0x24d   : > { %1141 = vmatprep.subr.msk.mxu1 %vm471_vm0, %v871_v46 }
 0x24e   : > { %1142 = vmatpush1.msk.msra.mxu1 %vm471_vm0, %v869_v45 }
 0x24f   : > { %1143 = vmatmul.mubr.msk.f32.vlgmr.msra.gmra.mrb[0].mxu1 %vm468_vm1, %v875_v47 }
 0x255   : > { %v544_v48 = vpop.f32.mrb[2].mxu0 }
 0x256   : > { %v546_v49 = vpop.f32.mrb[3].mxu0 }
 0x322   : > { %v950_v50 = vpop.f32.mrb[0].mxu1 }
 0x323   : > { %v1171_v51 = vadd.f32 %v950_v50, %v544_v48  ;;  %v952_v52 = vpop.f32.mrb[1].mxu1 }
 0x324   : > { %v1172_v53 = vadd.f32 %v952_v52, %v546_v49 }
 0x325   : > { %957 = vst [vmem:[%s366_s30] sm:$0xff] %v1171_v51 }
 0x326   : > { %958 = vst [vmem:[%s366_s30 + $0x8] sm:$0xff] %v1172_v53 }
 0x327   : > { %1382 = shalt.err (!%p1379_p2)
}
 0x328   : > { %s1383_s20 = scalar_lea.hbm %s1757_s8, 256  ;;  %s1387_s27 = scalar_lea.hbm %s1807_s6, 512 }
 0x329   : > { %p1384_p13 = scmp.ne.s32.totalorder %s1757_s8, %s1383_s20  ;;  %p1388_p1 = scmp.lt.u32.totalorder %s1757_s8, %s1807_s6 }
 0x32a   : > { %p1389_p10 = scmp.lt.u32.totalorder %s1387_s27, %s1383_s20  ;;  %p1391_p9 = scmp.lt.u32.totalorder %s1383_s20, %s1757_s8 }
 0x32b   : > { %p1385_p0 = pnand %p1384_p13, %p1848_p12 }
 0x32c   : > { %p1390_p4 = por %p1389_p10, %p1388_p1 }
 0x32d   : > { %p1386_p6 = pneg %p1385_p0 }
 0x32e   : > { %p1392_p3 = por %p1391_p9, %p1390_p4 }
 0x330   : > { %p1393_p8 = pnand %p1392_p3, %p1386_p6 }
 0x332   : > { %1396 = shalt.err (!%p1393_p8)
}
 0x333   : > { %1187 = dma.vmem_to_hbm [thread:$0]  (%p1848_p12), %s1759_s15, 256, %s1757_s8, %s960_s17  }
 0x334 PF: > { %s1849_s16 = sld [smem:[#allocation15_spill]]  ;;  %s1850_s26 = sld [smem:[#allocation20_spill]] }
 0x335   : > { %s1851_s1 = sld [smem:[#allocation17_spill]] }
 0x33a   : > { %s986_s9 = sand.u32 1, %s1849_s16   ;;  %p1852_p5 = scmp.ne.s32.totalorder %s1850_s26, 0 }
 0x33b   : > { %p1853_p7 = scmp.ge.s32.totalorder %s1851_s1, 2  ;;  %s987_s28 = scalar_lea.sflag [#allocation4], %s986_s9 }
 0x33d   : > { %p1204_p11 = pnand %p1853_p7, %p1852_p5 }
 0x33f   : > { %1426 = dma.done.wait (!%p1204_p11), %s987_s28, 256  }
 0x340   : > { %1428 = vsyncadd (!%p1204_p11), %s987_s28, 4294967040  ;;  %s1854_s24 = sld [smem:[#allocation18_spill]]  ;;  %s1855_s29 = sld [smem:[#allocation16_spill]] }
 0x341   : > { %s1856_s23 = sld [smem:[#allocation19_spill]]  ;;  %s1857_s21 = smov %s1435_s22 }
 0x346   : > { %p23_p2 = scmp.ge.s32.totalorder %s1854_s24, 4   ;;  %s1858_s22 = smov %s1855_s29 }
 0x348   :  { %25 = sbr.rel (!%p23_p2) target bundleno = 10 (0xa), region = 120 }
 0x34f   :  { %992 = vsyncpa [#allocation3], 1 }
 0x350   :  { %994 = vsyncpa [#allocation3 + $0x1], 1 }
 0x351   :  { %995 = vsyncpa [#allocation6], 1 }
 0x352   :  { %997 = vsyncpa [#allocation6 + $0x1], 1 }
 0x353   :  { %998 = vsyncpa [#allocation9], 1 }
 0x354   :  { %999 = vsyncpa [#allocation4], 1 }
 0x355   :  { %1001 = vsyncpa [#allocation4 + $0x1], 1 }

</bundles_post_ra>
